<compile_context>
chip_gen: v7x
topology: tpu7x:2x2x1
jax: 0.10.0
libtpu: 0.0.40
codegen_flags: <defaults>
</compile_context>

<pallas_src>
import math
import functools

import jax
import jax.numpy as jnp
from jax import lax
from jax.experimental import pallas as pl
from jax.experimental.pallas import tpu as pltpu


# ---------------------------------------------------------------------------
# Small helpers
# ---------------------------------------------------------------------------
def _pick_tile(dim, target, align):
    """Largest tile <= target that is a multiple of `align` and divides `dim`
    exactly; falls back to the full dim (single block) if none exists."""
    if dim <= target:
        return dim
    t = (target // align) * align
    while t >= align:
        if dim % t == 0:
            return t
        t -= align
    return dim


def _vmem_limit_bytes(pipelined_bytes, resident_bytes):
    """Scoped-VMEM request: pipelined blocks are double-buffered, resident
    scratch (accumulators / cached weights) is single-buffered.  Returns None
    (compiler default) when the working set is small; otherwise caps at ~75%
    of this generation's physical VMEM (64 MiB v7x, 128 MiB v5e/v6e)."""
    need = 2 * int(pipelined_bytes) + int(resident_bytes)
    if need <= (12 << 20):
        return None
    cap = 48 << 20
    try:
        cap = int(pltpu.get_tpu_info().vmem_capacity_bytes) * 3 // 4
    except Exception:
        pass
    return int(min(need + (4 << 20), cap))


# ---------------------------------------------------------------------------
# Kernel 1: fused multi-output linear  y_g = x @ W_g + b_g  (lane-dense GEMM).
#   x: (M, K); W_g: (K, N); outputs: (M, N).
# Grid: (M_tiles, K_tiles).  When the weights fit VMEM, tk == K and the weight
# BlockSpec index is constant, so each weight is DMA'd once and kept resident.
# ---------------------------------------------------------------------------
def _fused_linear_kernel(x_ref, *refs, G):
    w_refs = refs[0:G]
    b_refs = refs[G:2 * G]
    o_refs = refs[2 * G:3 * G]
    acc_refs = refs[3 * G:4 * G]
    k = pl.program_id(1)

    @pl.when(k == 0)
    def _init():
        for acc in acc_refs:
            acc[...] = jnp.zeros_like(acc)

    x = x_ref[...]                                   # already in compute dtype
    for g in range(G):
        acc_refs[g][...] += jnp.dot(x, w_refs[g][...],
                                    preferred_element_type=jnp.float32)

    @pl.when(k == pl.num_programs(1) - 1)
    def _finalize():
        for g in range(G):
            o_refs[g][...] = (acc_refs[g][...] + b_refs[g][...]).astype(
                o_refs[g].dtype)


def _fused_linear(x, Ws, bs, *, out_dtype):
    """x: (M, K); Ws: tuple of (K, N) in compute dtype; bs: tuple of (N,) f32.
    Returns a tuple of (M, N) arrays, lane-dense in N."""
    M, K = x.shape
    N = Ws[0].shape[1]
    G = len(Ws)
    itm_x = jnp.dtype(x.dtype).itemsize
    itm_w = jnp.dtype(Ws[0].dtype).itemsize
    itm_o = jnp.dtype(out_dtype).itemsize

    tm = _pick_tile(M, 256, 8)
    budget = 24 << 20                       # conservative: leaves v7x headroom
    if G * K * N * itm_w <= budget:
        tk = K                              # weights fully VMEM-resident
    else:
        target = max(128, budget // (2 * G * N * itm_w))
        tk = _pick_tile(K, target, 128)
    grid = (pl.cdiv(M, tm), pl.cdiv(K, tk))

    x_spec = pl.BlockSpec((tm, tk), lambda i, k: (i, k))
    if tk == K:
        w_spec = pl.BlockSpec((K, N), lambda i, k: (0, 0))   # constant -> 1 DMA
    else:
        w_spec = pl.BlockSpec((tk, N), lambda i, k: (k, 0))
    b_spec = pl.BlockSpec((1, N), lambda i, k: (0, 0))
    o_spec = pl.BlockSpec((tm, N), lambda i, k: (i, 0))

    pipelined = (tm * tk * itm_x + G * tm * N * itm_o
                 + (0 if tk == K else G * tk * N * itm_w))
    resident = (G * tm * N * 4 + G * N * 4
                + (G * K * N * itm_w if tk == K else 0))

    kern = functools.partial(_fused_linear_kernel, G=G)
    outs = pl.pallas_call(
        kern,
        grid=grid,
        in_specs=[x_spec] + [w_spec] * G + [b_spec] * G,
        out_specs=tuple([o_spec] * G),
        out_shape=tuple(jax.ShapeDtypeStruct((M, N), out_dtype)
                        for _ in range(G)),
        scratch_shapes=[pltpu.VMEM((tm, N), jnp.float32) for _ in range(G)],
        compiler_params=pltpu.CompilerParams(
            dimension_semantics=("parallel", "arbitrary"),
            vmem_limit_bytes=_vmem_limit_bytes(pipelined, resident)),
    )(x, *Ws, *[b.reshape(1, -1).astype(jnp.float32) for b in bs])
    return outs


# ---------------------------------------------------------------------------
# Kernel 2: scaled-dot-product attention, grid = (B, H, Sq_tiles).
# The head split / merge lives entirely in the BlockSpec index maps: q/k/v are
# (tq|Sk, depth) lane slices of the (B, S, d_model) arrays, and the context is
# written straight back into a lane-dense (B, Sq, d_model) array.
# ---------------------------------------------------------------------------
def _attn_kernel(*refs, has_bias, return_weights, exact_softmax):
    q_ref, k_ref, v_ref = refs[0], refs[1], refs[2]
    i = 3
    bias_ref = None
    if has_bias:
        bias_ref = refs[i]
        i += 1
    o_ref = refs[i]
    i += 1
    w_ref = refs[i] if return_weights else None

    q = q_ref[...]                       # (tq, depth); scale folded into W_Q
    k = k_ref[...]                       # (Sk, depth)
    v = v_ref[...]                       # (Sk, depth)

    # Transpose-free QK^T: contract on the last axis of both operands.
    s = lax.dot_general(q, k, (((1,), (1,)), ((), ())),
                        preferred_element_type=jnp.float32)   # (tq, Sk) f32
    if has_bias:
        s = s + bias_ref[...]            # (1|tq, Sk) broadcasts over sublanes

    m = jnp.max(s, axis=-1, keepdims=True)
    e = jnp.exp(s - m)
    denom = jnp.sum(e, axis=-1, keepdims=True)
    if exact_softmax:
        p = e / denom                    # exact (parity with reference)
    else:
        p = e * pl.reciprocal(denom, approx=True)   # EUP, bf16 fast path

    if return_weights:
        w_ref[...] = p.astype(w_ref.dtype)
    o_ref[...] = jnp.dot(p.astype(v.dtype), v,
                         preferred_element_type=jnp.float32).astype(o_ref.dtype)


def _attention(q, k, v, bias, *, num_heads, return_weights, compute_dtype,
               packed):
    """packed=True:  q/k/v are (B, S, d_model) lane-dense; context returned as
                     (B, Sq, d_model).
       packed=False: q/k/v are (B, H, S, depth); context returned head-split.
       bias: None or f32 additive bias in its original broadcastable 4-D shape
             (Bb, Hb, 1|Sq, Sk)."""
    if packed:
        B, Sq, d_model = q.shape
        Sk = k.shape[1]
        H = num_heads
        depth = d_model // num_heads
    else:
        B, H, Sq, depth = q.shape
        Sk = k.shape[2]
    itm = jnp.dtype(compute_dtype).itemsize

    tq = _pick_tile(Sq, 256, 8)
    grid = (B, H, pl.cdiv(Sq, tq))

    if packed:
        q_spec = pl.BlockSpec((None, tq, depth), lambda b, h, qi: (b, qi, h))
        kv_spec = pl.BlockSpec((None, Sk, depth), lambda b, h, qi: (b, 0, h))
        o_spec = pl.BlockSpec((None, tq, depth), lambda b, h, qi: (b, qi, h))
        o_shape = jax.ShapeDtypeStruct((B, Sq, d_model), compute_dtype)
    else:
        q_spec = pl.BlockSpec((None, None, tq, depth),
                              lambda b, h, qi: (b, h, qi, 0))
        kv_spec = pl.BlockSpec((None, None, Sk, depth),
                               lambda b, h, qi: (b, h, 0, 0))
        o_spec = pl.BlockSpec((None, None, tq, depth),
                              lambda b, h, qi: (b, h, qi, 0))
        o_shape = jax.ShapeDtypeStruct((B, H, Sq, depth), compute_dtype)

    in_specs = [q_spec, kv_spec, kv_spec]
    args = [q, k, v]
    has_bias = bias is not None
    bias_bytes = 0
    if has_bias:
        Bb, Hb, Qb, _ = bias.shape
        bq = tq if Qb > 1 else 1

        def bias_map(b, h, qi, _Bb=Bb, _Hb=Hb, _Qb=Qb):
            return (b if _Bb > 1 else 0,
                    h if _Hb > 1 else 0,
                    qi if _Qb > 1 else 0,
                    0)

        in_specs.append(pl.BlockSpec((None, None, bq, Sk), bias_map))
        args.append(bias)
        bias_bytes = bq * Sk * 4

    out_specs = [o_spec]
    out_shapes = [o_shape]
    if return_weights:
        out_specs.append(pl.BlockSpec((None, None, tq, Sk),
                                      lambda b, h, qi: (b, h, qi, 0)))
        out_shapes.append(jax.ShapeDtypeStruct((B, H, Sq, Sk), compute_dtype))

    exact = return_weights or jnp.dtype(compute_dtype) == jnp.dtype(jnp.float32)
    pipelined = ((2 * tq * depth + 2 * Sk * depth) * itm + bias_bytes
                 + (tq * Sk * itm if return_weights else 0))
    resident = 3 * tq * Sk * 4            # live f32 scores / exp working set

    kern = functools.partial(_attn_kernel, has_bias=has_bias,
                             return_weights=return_weights,
                             exact_softmax=exact)
    res = pl.pallas_call(
        kern,
        grid=grid,
        in_specs=in_specs,
        out_specs=tuple(out_specs),
        out_shape=tuple(out_shapes),
        compiler_params=pltpu.CompilerParams(
            dimension_semantics=("parallel", "parallel", "arbitrary"),
            vmem_limit_bytes=_vmem_limit_bytes(pipelined, resident)),
    )(*args)

    attn_w = res[1] if return_weights else None
    return res[0], attn_w


# ---------------------------------------------------------------------------
# MultiHeadAttention module (forward only), parameters held in a dict.
# ---------------------------------------------------------------------------
def init_mha_params(key, d_model):
    """Deterministic synthetic params. Weights stored as (D_in, D_out) so that
    y = x @ W + b matches torch's y = x @ weight.T + bias semantics."""
    ks = jax.random.split(key, 8)
    s = 1.0 / math.sqrt(d_model)

    def w(k):
        return jax.random.uniform(k, (d_model, d_model), jnp.float32, -s, s)

    def b(k):
        return jax.random.uniform(k, (d_model,), jnp.float32, -s, s)

    return dict(
        W_Q=w(ks[0]), b_Q=b(ks[1]),
        W_K=w(ks[2]), b_K=b(ks[3]),
        W_V=w(ks[4]), b_V=b(ks[5]),
        W_fc=w(ks[6]), b_fc=b(ks[7]),
    )


def multi_head_attention(params, query, key, value, num_heads, mask=None,
                         return_weights=True, compute_dtype=jnp.float32):
    """query/key/value: (B, S, d_model).  Returns (output, attention_weights).
    compute_dtype=jnp.bfloat16 feeds the MXU with bf16 (softmax and
    accumulation stay f32); the default f32 matches the PyTorch reference."""
    B, Sq, d_model = query.shape
    Sk = key.shape[1]
    depth = d_model // num_heads
    scale = 1.0 / math.sqrt(depth)
    cdt = compute_dtype

    # Fold 1/sqrt(depth) into W_Q/b_Q (one-time host op) and pre-cast weights
    # to the compute dtype (halves weight DMA bytes, removes per-step casts).
    W_Q = (params["W_Q"] * scale).astype(cdt)
    b_Q = params["b_Q"] * scale
    W_K = params["W_K"].astype(cdt)
    W_V = params["W_V"].astype(cdt)
    W_fc = params["W_fc"].astype(cdt)
    b_K, b_V, b_fc = params["b_K"], params["b_V"], params["b_fc"]

    # Fused projections: lane-dense (B*S, d_model) GEMMs, x read from HBM once.
    q2 = query.reshape(B * Sq, d_model).astype(cdt)
    if (query is key) and (key is value):
        qp, kp, vp = _fused_linear(q2, (W_Q, W_K, W_V), (b_Q, b_K, b_V),
                                   out_dtype=cdt)
    else:
        (qp,) = _fused_linear(q2, (W_Q,), (b_Q,), out_dtype=cdt)
        k2 = key.reshape(B * Sk, d_model).astype(cdt)
        if key is value:
            kp, vp = _fused_linear(k2, (W_K, W_V), (b_K, b_V), out_dtype=cdt)
        else:
            (kp,) = _fused_linear(k2, (W_K,), (b_K,), out_dtype=cdt)
            v2 = value.reshape(B * Sk, d_model).astype(cdt)
            (vp,) = _fused_linear(v2, (W_V,), (b_V,), out_dtype=cdt)
    qp = qp.reshape(B, Sq, d_model)
    kp = kp.reshape(B, Sk, d_model)
    vp = vp.reshape(B, Sk, d_model)

    # Mask -> additive f32 bias kept in its ORIGINAL broadcastable shape
    # (never materialised over Sq / B / H in HBM).
    bias = None
    if mask is not None:
        m = jnp.asarray(mask)
        m = m.reshape((1,) * (4 - m.ndim) + tuple(m.shape))
        bias = jnp.where(m == 0, jnp.float32(-1e9), jnp.float32(0.0))
        if bias.shape[-1] == 1 and Sk > 1:
            bias = jnp.broadcast_to(bias, bias.shape[:-1] + (Sk,))

    packed = (depth % 128 == 0) or (num_heads == 1)
    if packed:
        ctx, attn_w = _attention(qp, kp, vp, bias, num_heads=num_heads,
                                 return_weights=return_weights,
                                 compute_dtype=cdt, packed=True)
        ctx2 = ctx.reshape(B * Sq, d_model)
    else:
        # TODO(synk): unaligned depth -> head split/merge via XLA transposes.
        qh = qp.reshape(B, Sq, num_heads, depth).transpose(0, 2, 1, 3)
        kh = kp.reshape(B, Sk, num_heads, depth).transpose(0, 2, 1, 3)
        vh = vp.reshape(B, Sk, num_heads, depth).transpose(0, 2, 1, 3)
        ctx, attn_w = _attention(qh, kh, vh, bias, num_heads=num_heads,
                                 return_weights=return_weights,
                                 compute_dtype=cdt, packed=False)
        ctx2 = ctx.transpose(0, 2, 1, 3).reshape(B * Sq, d_model)

    # Output projection: standard full-K lane-dense GEMM.
    (out2,) = _fused_linear(ctx2, (W_fc,), (b_fc,), out_dtype=jnp.float32)
    out = out2.reshape(B, Sq, d_model)
    return out, attn_w


# ---------------------------------------------------------------------------
# Pure-JAX reference for correctness checks.
# ---------------------------------------------------------------------------
def reference_mha(params, query, key, value, num_heads, mask=None):
    B, Sq, d_model = query.shape
    Sk = key.shape[1]
    depth = d_model // num_heads
    q = query @ params["W_Q"] + params["b_Q"]
    k = key @ params["W_K"] + params["b_K"]
    v = value @ params["W_V"] + params["b_V"]
    q = q.reshape(B, Sq, num_heads, depth).transpose(0, 2, 1, 3)
    k = k.reshape(B, Sk, num_heads, depth).transpose(0, 2, 1, 3)
    v = v.reshape(B, Sk, num_heads, depth).transpose(0, 2, 1, 3)
    scores = jnp.einsum("bhqd,bhkd->bhqk", q, k) / math.sqrt(depth)
    if mask is not None:
        scores = jnp.where(jnp.broadcast_to(mask, scores.shape) == 0,
                           -1e9, scores)
    w = jax.nn.softmax(scores, axis=-1)
    o = jnp.einsum("bhqk,bhkd->bhqd", w, v)
    o = o.transpose(0, 2, 1, 3).reshape(B, Sq, d_model)
    o = o @ params["W_fc"] + params["b_fc"]
    return o, w


if __name__ == "__main__":
    root = jax.random.PRNGKey(0)
    k_params, k_x, k_q, k_kv, k_p2, k_x2 = jax.random.split(root, 6)

    # --- Config A: lane-aligned heads (depth = 128) -------------------------
    B, S, d_model, num_heads = 2, 16, 256, 2
    params = init_mha_params(k_params, d_model)

    # Test 1: self-attention (fused QKV), f32, weights returned.
    x = jax.random.normal(k_x, (B, S, d_model), jnp.float32)
    out, attn_w = multi_head_attention(params, x, x, x, num_heads)
    out = jax.block_until_ready(out)
    attn_w = jax.block_until_ready(attn_w)
    ref_out, ref_w = reference_mha(params, x, x, x, num_heads)
    assert out.shape == (B, S, d_model)
    assert attn_w.shape == (B, num_heads, S, S)
    assert jnp.allclose(out, ref_out, atol=2e-3, rtol=2e-3)
    assert jnp.allclose(attn_w, ref_w, atol=2e-3, rtol=2e-3)

    # Test 2: cross-attention (separate Q, fused KV) + padding mask.
    q_in = jax.random.normal(k_q, (B, S, d_model), jnp.float32)
    kv_in = jax.random.normal(k_kv, (B, S, d_model), jnp.float32)
    mask = (jnp.arange(S)[None, None, None, :] < (S - 3)).astype(jnp.int32)
    mask = jnp.broadcast_to(mask, (B, 1, 1, S))
    out2, w2 = multi_head_attention(params, q_in, kv_in, kv_in, num_heads,
                                    mask=mask)
    out2 = jax.block_until_ready(out2)
    ref_out2, ref_w2 = reference_mha(params, q_in, kv_in, kv_in, num_heads,
                                     mask=mask)
    assert jnp.allclose(out2, ref_out2, atol=2e-3, rtol=2e-3)
    assert jnp.allclose(w2, ref_w2, atol=2e-3, rtol=2e-3)

    # Test 3: bf16 MXU compute path, attention-weights writeback skipped.
    out3, none_w = multi_head_attention(params, x, x, x, num_heads,
                                        compute_dtype=jnp.bfloat16,
                                        return_weights=False)
    out3 = jax.block_until_ready(out3)
    assert none_w is None
    assert out3.shape == (B, S, d_model)
    assert float(jnp.max(jnp.abs(out3.astype(jnp.float32) - ref_out))) < 0.1

    # --- Config B: small unaligned head dim (depth = 8) -> fallback split ---
    B2, S2, d2, h2 = 2, 8, 32, 4
    params2 = init_mha_params(k_p2, d2)
    x2 = jax.random.normal(k_x2, (B2, S2, d2), jnp.float32)
    out4, w4 = multi_head_attention(params2, x2, x2, x2, h2)
    out4 = jax.block_until_ready(out4)
    ref_out4, ref_w4 = reference_mha(params2, x2, x2, x2, h2)
    assert jnp.allclose(out4, ref_out4, atol=2e-3, rtol=2e-3)
    assert jnp.allclose(w4, ref_w4, atol=2e-3, rtol=2e-3)

    print("KERNEL_OK")
</pallas_src>

<mosaic_0001>
module attributes {stable_mosaic.version = 11 : i64} {
  func.func @_fused_linear_kernel(%arg0: i32, %arg1: i32, %arg2: memref<32x256xf32, #tpu.memory_space<vmem>>, %arg3: memref<256x256xf32, #tpu.memory_space<vmem>>, %arg4: memref<256x256xf32, #tpu.memory_space<vmem>>, %arg5: memref<256x256xf32, #tpu.memory_space<vmem>>, %arg6: memref<1x256xf32, #tpu.memory_space<vmem>>, %arg7: memref<1x256xf32, #tpu.memory_space<vmem>>, %arg8: memref<1x256xf32, #tpu.memory_space<vmem>>, %arg9: memref<32x256xf32, #tpu.memory_space<vmem>>, %arg10: memref<32x256xf32, #tpu.memory_space<vmem>>, %arg11: memref<32x256xf32, #tpu.memory_space<vmem>>, %arg12: memref<32x256xf32, #tpu.memory_space<vmem>>, %arg13: memref<32x256xf32, #tpu.memory_space<vmem>>, %arg14: memref<32x256xf32, #tpu.memory_space<vmem>>) attributes {dimension_semantics = [#tpu.dimension_semantics<parallel>, #tpu.dimension_semantics<arbitrary>], iteration_bounds = array<i64: 1, 1>, scalar_prefetch = 0 : i64, scratch_operands = 3 : i64, tpu.core_type = #tpu.core_type<tc>, window_params = [{transform_indices = @transform_0, window_bounds = array<i64: 32, 256>}, {pipeline_mode = #tpu.pipeline_mode<synchronous>, transform_indices = @transform_1, window_bounds = array<i64: 256, 256>}, {pipeline_mode = #tpu.pipeline_mode<synchronous>, transform_indices = @transform_2, window_bounds = array<i64: 256, 256>}, {pipeline_mode = #tpu.pipeline_mode<synchronous>, transform_indices = @transform_3, window_bounds = array<i64: 256, 256>}, {pipeline_mode = #tpu.pipeline_mode<synchronous>, transform_indices = @transform_4, window_bounds = array<i64: 1, 256>}, {pipeline_mode = #tpu.pipeline_mode<synchronous>, transform_indices = @transform_5, window_bounds = array<i64: 1, 256>}, {pipeline_mode = #tpu.pipeline_mode<synchronous>, transform_indices = @transform_6, window_bounds = array<i64: 1, 256>}, {transform_indices = @transform_7, window_bounds = array<i64: 32, 256>}, {transform_indices = @transform_8, window_bounds = array<i64: 32, 256>}, {transform_indices = @transform_9, window_bounds = array<i64: 32, 256>}]} {
    %c0_i32 = arith.constant 0 : i32
    %0 = arith.cmpi eq, %arg1, %c0_i32 : i32
    %1 = arith.extui %0 : i1 to i32
    %c0_i32_0 = arith.constant 0 : i32
    %2 = arith.cmpi ne, %1, %c0_i32_0 : i32
    scf.if %2 {
      %cst_24 = arith.constant 0.000000e+00 : f32
      %22 = vector.broadcast %cst_24 : f32 to vector<32x256xf32>
      %c0_25 = arith.constant 0 : index
      %c0_26 = arith.constant 0 : index
      %23 = vector.load %arg12[%c0_25, %c0_26] : memref<32x256xf32, #tpu.memory_space<vmem>>, vector<32x256xf32>
      tpu.vector_store %arg12[%c0_25, %c0_26], %22 {strides = array<i32>} : memref<32x256xf32, #tpu.memory_space<vmem>>, vector<32x256xf32>,
      %cst_27 = arith.constant 0.000000e+00 : f32
      %24 = vector.broadcast %cst_27 : f32 to vector<32x256xf32>
      %c0_28 = arith.constant 0 : index
      %c0_29 = arith.constant 0 : index
      %25 = vector.load %arg13[%c0_28, %c0_29] : memref<32x256xf32, #tpu.memory_space<vmem>>, vector<32x256xf32>
      tpu.vector_store %arg13[%c0_28, %c0_29], %24 {strides = array<i32>} : memref<32x256xf32, #tpu.memory_space<vmem>>, vector<32x256xf32>,
      %cst_30 = arith.constant 0.000000e+00 : f32
      %26 = vector.broadcast %cst_30 : f32 to vector<32x256xf32>
      %c0_31 = arith.constant 0 : index
      %c0_32 = arith.constant 0 : index
      %27 = vector.load %arg14[%c0_31, %c0_32] : memref<32x256xf32, #tpu.memory_space<vmem>>, vector<32x256xf32>
      tpu.vector_store %arg14[%c0_31, %c0_32], %26 {strides = array<i32>} : memref<32x256xf32, #tpu.memory_space<vmem>>, vector<32x256xf32>,
    } else {
    }
    %c0 = arith.constant 0 : index
    %c0_1 = arith.constant 0 : index
    %3 = vector.load %arg2[%c0, %c0_1] : memref<32x256xf32, #tpu.memory_space<vmem>>, vector<32x256xf32>
    %c0_2 = arith.constant 0 : index
    %c0_3 = arith.constant 0 : index
    %4 = vector.load %arg12[%c0_2, %c0_3] : memref<32x256xf32, #tpu.memory_space<vmem>>, vector<32x256xf32>
    %c0_4 = arith.constant 0 : index
    %c0_5 = arith.constant 0 : index
    %5 = vector.load %arg3[%c0_4, %c0_5] : memref<256x256xf32, #tpu.memory_space<vmem>>, vector<256x256xf32>
    %cst = arith.constant dense<0.000000e+00> : vector<32x256xf32>
    %6 = tpu.matmul %3, %5, %cst {dimension_numbers = #tpu.dot_dimension_numbers<[1], [0], [0], [1], [0, 0, 1, 1], [], []>} : vector<32x256xf32>, vector<256x256xf32>, vector<32x256xf32> -> vector<32x256xf32>
    %7 = arith.addf %4, %6 : vector<32x256xf32>
    %c0_6 = arith.constant 0 : index
    %c0_7 = arith.constant 0 : index
    %8 = vector.load %arg12[%c0_6, %c0_7] : memref<32x256xf32, #tpu.memory_space<vmem>>, vector<32x256xf32>
    tpu.vector_store %arg12[%c0_6, %c0_7], %7 {strides = array<i32>} : memref<32x256xf32, #tpu.memory_space<vmem>>, vector<32x256xf32>,
    %c0_8 = arith.constant 0 : index
    %c0_9 = arith.constant 0 : index
    %9 = vector.load %arg13[%c0_8, %c0_9] : memref<32x256xf32, #tpu.memory_space<vmem>>, vector<32x256xf32>
    %c0_10 = arith.constant 0 : index
    %c0_11 = arith.constant 0 : index
    %10 = vector.load %arg4[%c0_10, %c0_11] : memref<256x256xf32, #tpu.memory_space<vmem>>, vector<256x256xf32>
    %cst_12 = arith.constant dense<0.000000e+00> : vector<32x256xf32>
    %11 = tpu.matmul %3, %10, %cst_12 {dimension_numbers = #tpu.dot_dimension_numbers<[1], [0], [0], [1], [0, 0, 1, 1], [], []>} : vector<32x256xf32>, vector<256x256xf32>, vector<32x256xf32> -> vector<32x256xf32>
    %12 = arith.addf %9, %11 : vector<32x256xf32>
    %c0_13 = arith.constant 0 : index
    %c0_14 = arith.constant 0 : index
    %13 = vector.load %arg13[%c0_13, %c0_14] : memref<32x256xf32, #tpu.memory_space<vmem>>, vector<32x256xf32>
    tpu.vector_store %arg13[%c0_13, %c0_14], %12 {strides = array<i32>} : memref<32x256xf32, #tpu.memory_space<vmem>>, vector<32x256xf32>,
    %c0_15 = arith.constant 0 : index
    %c0_16 = arith.constant 0 : index
    %14 = vector.load %arg14[%c0_15, %c0_16] : memref<32x256xf32, #tpu.memory_space<vmem>>, vector<32x256xf32>
    %c0_17 = arith.constant 0 : index
    %c0_18 = arith.constant 0 : index
    %15 = vector.load %arg5[%c0_17, %c0_18] : memref<256x256xf32, #tpu.memory_space<vmem>>, vector<256x256xf32>
    %cst_19 = arith.constant dense<0.000000e+00> : vector<32x256xf32>
    %16 = tpu.matmul %3, %15, %cst_19 {dimension_numbers = #tpu.dot_dimension_numbers<[1], [0], [0], [1], [0, 0, 1, 1], [], []>} : vector<32x256xf32>, vector<256x256xf32>, vector<32x256xf32> -> vector<32x256xf32>
    %17 = arith.addf %14, %16 : vector<32x256xf32>
    %c0_20 = arith.constant 0 : index
    %c0_21 = arith.constant 0 : index
    %18 = vector.load %arg14[%c0_20, %c0_21] : memref<32x256xf32, #tpu.memory_space<vmem>>, vector<32x256xf32>
    tpu.vector_store %arg14[%c0_20, %c0_21], %17 {strides = array<i32>} : memref<32x256xf32, #tpu.memory_space<vmem>>, vector<32x256xf32>,
    %c0_i32_22 = arith.constant 0 : i32
    %19 = arith.cmpi eq, %arg1, %c0_i32_22 : i32
    %20 = arith.extui %19 : i1 to i32
    %c0_i32_23 = arith.constant 0 : i32
    %21 = arith.cmpi ne, %20, %c0_i32_23 : i32
    scf.if %21 {
      %c0_24 = arith.constant 0 : index
      %c0_25 = arith.constant 0 : index
      %22 = vector.load %arg12[%c0_24, %c0_25] : memref<32x256xf32, #tpu.memory_space<vmem>>, vector<32x256xf32>
      %c0_26 = arith.constant 0 : index
      %c0_27 = arith.constant 0 : index
      %23 = vector.load %arg6[%c0_26, %c0_27] : memref<1x256xf32, #tpu.memory_space<vmem>>, vector<1x256xf32>
      %24 = vector.broadcast %23 : vector<1x256xf32> to vector<32x256xf32>
      %25 = arith.addf %22, %24 : vector<32x256xf32>
      %c0_28 = arith.constant 0 : index
      %c0_29 = arith.constant 0 : index
      %26 = vector.load %arg9[%c0_28, %c0_29] : memref<32x256xf32, #tpu.memory_space<vmem>>, vector<32x256xf32>
      tpu.vector_store %arg9[%c0_28, %c0_29], %25 {strides = array<i32>} : memref<32x256xf32, #tpu.memory_space<vmem>>, vector<32x256xf32>,
      %c0_30 = arith.constant 0 : index
      %c0_31 = arith.constant 0 : index
      %27 = vector.load %arg13[%c0_30, %c0_31] : memref<32x256xf32, #tpu.memory_space<vmem>>, vector<32x256xf32>
      %c0_32 = arith.constant 0 : index
      %c0_33 = arith.constant 0 : index
      %28 = vector.load %arg7[%c0_32, %c0_33] : memref<1x256xf32, #tpu.memory_space<vmem>>, vector<1x256xf32>
      %29 = vector.broadcast %28 : vector<1x256xf32> to vector<32x256xf32>
      %30 = arith.addf %27, %29 : vector<32x256xf32>
      %c0_34 = arith.constant 0 : index
      %c0_35 = arith.constant 0 : index
      %31 = vector.load %arg10[%c0_34, %c0_35] : memref<32x256xf32, #tpu.memory_space<vmem>>, vector<32x256xf32>
      tpu.vector_store %arg10[%c0_34, %c0_35], %30 {strides = array<i32>} : memref<32x256xf32, #tpu.memory_space<vmem>>, vector<32x256xf32>,
      %c0_36 = arith.constant 0 : index
      %c0_37 = arith.constant 0 : index
      %32 = vector.load %arg14[%c0_36, %c0_37] : memref<32x256xf32, #tpu.memory_space<vmem>>, vector<32x256xf32>
      %c0_38 = arith.constant 0 : index
      %c0_39 = arith.constant 0 : index
      %33 = vector.load %arg8[%c0_38, %c0_39] : memref<1x256xf32, #tpu.memory_space<vmem>>, vector<1x256xf32>
      %34 = vector.broadcast %33 : vector<1x256xf32> to vector<32x256xf32>
      %35 = arith.addf %32, %34 : vector<32x256xf32>
      %c0_40 = arith.constant 0 : index
      %c0_41 = arith.constant 0 : index
      %36 = vector.load %arg11[%c0_40, %c0_41] : memref<32x256xf32, #tpu.memory_space<vmem>>, vector<32x256xf32>
      tpu.vector_store %arg11[%c0_40, %c0_41], %35 {strides = array<i32>} : memref<32x256xf32, #tpu.memory_space<vmem>>, vector<32x256xf32>,
    } else {
    }
    return
  }
  func.func @transform_0(%arg0: i32, %arg1: i32) -> (i32, i32) {
    %c0_i32 = arith.constant 0 : i32
    return %arg0, %arg1 : i32, i32
  }
  func.func @transform_1(%arg0: i32, %arg1: i32) -> (i32, i32) {
    %c0_i32 = arith.constant 0 : i32
    %c0_i32_0 = arith.constant 0 : i32
    %c0_i32_1 = arith.constant 0 : i32
    return %c0_i32, %c0_i32_0 : i32, i32
  }
  func.func @transform_2(%arg0: i32, %arg1: i32) -> (i32, i32) {
    %c0_i32 = arith.constant 0 : i32
    %c0_i32_0 = arith.constant 0 : i32
    %c0_i32_1 = arith.constant 0 : i32
    return %c0_i32, %c0_i32_0 : i32, i32
  }
  func.func @transform_3(%arg0: i32, %arg1: i32) -> (i32, i32) {
    %c0_i32 = arith.constant 0 : i32
    %c0_i32_0 = arith.constant 0 : i32
    %c0_i32_1 = arith.constant 0 : i32
    return %c0_i32, %c0_i32_0 : i32, i32
  }
  func.func @transform_4(%arg0: i32, %arg1: i32) -> (i32, i32) {
    %c0_i32 = arith.constant 0 : i32
    %c0_i32_0 = arith.constant 0 : i32
    %c0_i32_1 = arith.constant 0 : i32
    return %c0_i32, %c0_i32_0 : i32, i32
  }
  func.func @transform_5(%arg0: i32, %arg1: i32) -> (i32, i32) {
    %c0_i32 = arith.constant 0 : i32
    %c0_i32_0 = arith.constant 0 : i32
    %c0_i32_1 = arith.constant 0 : i32
    return %c0_i32, %c0_i32_0 : i32, i32
  }
  func.func @transform_6(%arg0: i32, %arg1: i32) -> (i32, i32) {
    %c0_i32 = arith.constant 0 : i32
    %c0_i32_0 = arith.constant 0 : i32
    %c0_i32_1 = arith.constant 0 : i32
    return %c0_i32, %c0_i32_0 : i32, i32
  }
  func.func @transform_7(%arg0: i32, %arg1: i32) -> (i32, i32) {
    %c0_i32 = arith.constant 0 : i32
    %c0_i32_0 = arith.constant 0 : i32
    return %arg0, %c0_i32 : i32, i32
  }
  func.func @transform_8(%arg0: i32, %arg1: i32) -> (i32, i32) {
    %c0_i32 = arith.constant 0 : i32
    %c0_i32_0 = arith.constant 0 : i32
    return %arg0, %c0_i32 : i32, i32
  }
  func.func @transform_9(%arg0: i32, %arg1: i32) -> (i32, i32) {
    %c0_i32 = arith.constant 0 : i32
    %c0_i32_0 = arith.constant 0 : i32
    return %arg0, %c0_i32 : i32, i32
  }
}

</mosaic_0001>

<bundles_post_ra>
// kernel: tpu_custom_call.1
= control target key start
LH: loop header
LB: loop body
LE: loop exit
PB: predicated region body
PF: predicated region fallthrough
CT: control target
= control target key end

     0   :  { %15 = vsyncpa [#allocation6], 0  ;;  %s1450_s0 = inlined_call_operand.hbm [shape: f32[32,256], index: 0, kind: input, shape index: {}]   ;;  %s1451_s1 = inlined_call_operand.hbm [shape: f32[256,256], index: 1, kind: input, shape index: {}]   ;;  %s1452_s2 = inlined_call_operand.hbm [shape: f32[256,256], index: 2, kind: input, shape index: {}]   ;;  %s1453_s3 = inlined_call_operand.hbm [shape: f32[256,256], index: 3, kind: input, shape index: {}]   ;;  %s1454_s4 = inlined_call_operand.vmem [shape: f32[1,256], index: 4, kind: input, shape index: {}]   ;;  %s1455_s5 = inlined_call_operand.vmem [shape: f32[1,256], index: 5, kind: input, shape index: {}]   ;;  %s1456_s6 = inlined_call_operand.vmem [shape: f32[1,256], index: 6, kind: input, shape index: {}]   ;;  %s1457_s7 = inlined_call_operand.hbm [shape: f32[32,256], index: 7, kind: output, shape index: {0}]   ;;  %s1458_s8 = inlined_call_operand.hbm [shape: f32[32,256], index: 8, kind: output, shape index: {1}]   ;;  %s1459_s9 = inlined_call_operand.hbm [shape: f32[32,256], index: 9, kind: output, shape index: {2}]  }
   0x1   :  { %16 = vsyncpa [#allocation9], 0 }
   0x2   :  { %17 = vsyncpa [#allocation12], 0 }
   0x3   :  { %18 = vsyncpa [#allocation7], 0 }
   0x4   :  { %19 = vsyncpa [#allocation15], 0  ;;  %s1211_s30 = smov [#allocation8]   ;;  %s1212_s11 = smov [#allocation5]  }
   0x5   :  { %s37_s10 = sshll.u32 %s1211_s30, 4  ;;  %s25_s12 = sshll.u32 %s1212_s11, 4  ;;  %s38_s10 = int_to_ptr.vmem [resolvable:$true] %s37_s10  ;;  %s1270_s12 = int_to_ptr.vmem [resolvable:$true] %s25_s12 }
   0x6   :  { %s1047_s15 = scalar_lea.hbm %s1451_s1, 8192 }
   0x7   :  { %p1048_p0 = scmp.ne.s32.totalorder %s1451_s1, %s1047_s15  ;;  %p1051_p1 = scmp.lt.u32.totalorder %s1047_s15, %s1451_s1 }
   0x9   :  { %p1053_p2 = pnand %p1051_p1, %p1048_p0 }
   0xb   :  { %1056 = shalt.err (!%p1053_p2)
}
   0xc   :  { %s1057_s20 = scalar_lea.vmem %s38_s10, 8192  ;;  %p1062_p4 = scmp.lt.s32.totalorder %s38_s10, %s38_s10 }
   0xd   :  { %p1058_p3 = scmp.ne.s32.totalorder %s38_s10, %s1057_s20  ;;  %p1063_p5 = scmp.lt.s32.totalorder %s1057_s20, %s1057_s20 }
   0xf   :  { %p1064_p6 = por %p1063_p5, %p1062_p4 }
  0x11   :  { %p1065_p7 = pnand %p1064_p6, %p1058_p3 }
  0x13   :  { %1068 = shalt.err (!%p1065_p7)
}
  0x14   :  { %s1213_s21 = smov 256   ;;  %s1214_s22 = smov 16  }
  0x15   :  { %43 = dma.hbm_to_vmem [thread:$0]  %s1451_s1, 8192, %s38_s10, [#allocation9], %s1213_s21, %s1213_s21, %s1214_s22  }
  0x16   :  { %s1069_s27 = scalar_lea.hbm %s1450_s0, 1024 }
  0x17   :  { %p1070_p8 = scmp.ne.s32.totalorder %s1450_s0, %s1069_s27  ;;  %p1073_p9 = scmp.lt.u32.totalorder %s1069_s27, %s1450_s0 }
  0x19   :  { %p1075_p10 = pnand %p1073_p9, %p1070_p8 }
  0x1b   :  { %1078 = shalt.err (!%p1075_p10)
}
  0x1c   :  { %s1079_s13 = scalar_lea.vmem %s1270_s12, 1024  ;;  %p1084_p12 = scmp.lt.s32.totalorder %s1270_s12, %s1270_s12 }
  0x1d   :  { %p1080_p11 = scmp.ne.s32.totalorder %s1270_s12, %s1079_s13  ;;  %p1085_p13 = scmp.lt.s32.totalorder %s1079_s13, %s1079_s13 }
  0x1f   :  { %p1086_p0 = por %p1085_p13, %p1084_p12 }
  0x21   :  { %p1087_p1 = pnand %p1086_p0, %p1080_p11 }
  0x23   :  { %1090 = shalt.err (!%p1087_p1)
}
  0x24   :  { %31 = dma.hbm_to_vmem [thread:$0]  %s1450_s0, 1024, %s1270_s12, [#allocation6], %s1213_s21, %s1213_s21, %s1214_s22  }
  0x25   :  { %s1215_s14 = smov [#allocation10]   ;;  %s1216_s16 = smov [#allocation11]  }
  0x26   :  { %s49_s15 = sshll.u32 %s1215_s14, 4  ;;  %s61_s17 = sshll.u32 %s1216_s16, 4  ;;  %s50_s15 = int_to_ptr.vmem [resolvable:$true] %s49_s15  ;;  %s1307_s17 = int_to_ptr.vmem [resolvable:$true] %s61_s17 }
  0x27   :  { %s1091_s20 = scalar_lea.hbm %s1452_s2, 8192 }
  0x28   :  { %p1092_p2 = scmp.ne.s32.totalorder %s1452_s2, %s1091_s20  ;;  %p1095_p3 = scmp.lt.u32.totalorder %s1091_s20, %s1452_s2 }
  0x2a   :  { %p1097_p4 = pnand %p1095_p3, %p1092_p2 }
  0x2c   :  { %1100 = shalt.err (!%p1097_p4)
}
  0x2d   :  { %s1101_s0 = scalar_lea.vmem %s50_s15, 8192  ;;  %p1106_p6 = scmp.lt.s32.totalorder %s50_s15, %s50_s15 }
  0x2e   :  { %p1102_p5 = scmp.ne.s32.totalorder %s50_s15, %s1101_s0  ;;  %p1107_p7 = scmp.lt.s32.totalorder %s1101_s0, %s1101_s0 }
  0x30   :  { %p1108_p8 = por %p1107_p7, %p1106_p6 }
  0x32   :  { %p1109_p9 = pnand %p1108_p8, %p1102_p5 }
  0x34   :  { %1112 = shalt.err (!%p1109_p9)
}
  0x35   :  { %55 = dma.hbm_to_vmem [thread:$0]  %s1452_s2, 8192, %s50_s15, [#allocation9], %s1213_s21, %s1213_s21, %s1214_s22  }
  0x36   :  { %s1113_s30 = scalar_lea.hbm %s1453_s3, 8192 }
  0x37   :  { %p1114_p10 = scmp.ne.s32.totalorder %s1453_s3, %s1113_s30  ;;  %p1117_p11 = scmp.lt.u32.totalorder %s1113_s30, %s1453_s3 }
  0x39   :  { %p1119_p12 = pnand %p1117_p11, %p1114_p10 }
  0x3b   :  { %1122 = shalt.err (!%p1119_p12)
}
  0x3c   :  { %s1123_s14 = scalar_lea.vmem %s1307_s17, 8192  ;;  %p1128_p0 = scmp.lt.s32.totalorder %s1307_s17, %s1307_s17 }
  0x3d   :  { %p1124_p13 = scmp.ne.s32.totalorder %s1307_s17, %s1123_s14  ;;  %p1129_p1 = scmp.lt.s32.totalorder %s1123_s14, %s1123_s14 }
  0x3f   :  { %p1130_p2 = por %p1129_p1, %p1128_p0 }
  0x41   :  { %p1131_p3 = pnand %p1130_p2, %p1124_p13 }
  0x43   :  { %1134 = shalt.err (!%p1131_p3)
}
  0x44   :  { %67 = dma.hbm_to_vmem [thread:$0]  %s1453_s3, 8192, %s1307_s17, [#allocation12], %s1213_s21, %s1213_s21, %s1214_s22  }
  0x45   :  { %1201 = dma.done.wait [#allocation6], 1024  }
  0x46   :  { %1202 = vsyncadd [#allocation6], 4294966272 }
  0x47   :  { %1203 = dma.done.wait [#allocation9], 16384  }
  0x48   :  { %1204 = vsyncadd [#allocation9], 4294950912 }
  0x49   :  { %1205 = dma.done.wait [#allocation12], 8192  }
  0x4a   :  { %1206 = vsyncadd [#allocation12], 4294959104  ;;  %v131_v0 = vld [vmem:[#allocation8 + $0x8] sm:$0xff]  ;;  %v133_v1 = vld [vmem:[#allocation8 + $0x18] sm:$0xff]  ;;  %s1218_s19 = smov [#allocation14]  }
  0x4b   :  { %v308_v2 = vld [vmem:[#allocation10 + $0x8] sm:$0xff]  ;;  %v814_v3 = vpack.c.bf16 %v133_v1, %v131_v0  ;;  %v310_v4 = vld [vmem:[#allocation10 + $0x18] sm:$0xff]  ;;  %v130_v5 = vld [vmem:[#allocation8] sm:$0xff]  ;;  %s781_s20 = sshll.u32 %s1218_s19, 4  ;;  %s1393_s20 = int_to_ptr.vmem [resolvable:$true] %s781_s20 }
  0x4c   :  { %v132_v6 = vld [vmem:[#allocation8 + $0x10] sm:$0xff]  ;;  %v878_v7 = vpack.c.bf16 %v310_v4, %v308_v2  ;;  %v307_v9 = vld [vmem:[#allocation10] sm:$0xff]  ;;  %v135_v11 = vld [vmem:[#allocation8 + $0x28] sm:$0xff] }
  0x4d   :  { %v816_v8 = vpack.c.bf16 %v132_v6, %v130_v5  ;;  %v309_v10 = vld [vmem:[#allocation10 + $0x10] sm:$0xff]  ;;  %815 = vmatprep.subr.bf16.mxu0 %v814_v3  ;;  %v137_v13 = vld [vmem:[#allocation8 + $0x38] sm:$0xff]  ;;  %v312_v14 = vld [vmem:[#allocation10 + $0x28] sm:$0xff] }
  0x4e   :  { %v880_v12 = vpack.c.bf16 %v309_v10, %v307_v9  ;;  %v314_v15 = vld [vmem:[#allocation10 + $0x38] sm:$0xff]  ;;  %879 = vmatprep.subr.bf16.mxu1 %v878_v7  ;;  %v818_v16 = vpack.c.bf16 %v137_v13, %v135_v11  ;;  %v134_v18 = vld [vmem:[#allocation8 + $0x20] sm:$0xff]  ;;  %v136_v19 = vld [vmem:[#allocation8 + $0x30] sm:$0xff] }
  0x4f   :  { %817 = vmatpush1.bf16.msra.mxu0 %v816_v8  ;;  %v882_v17 = vpack.c.bf16 %v314_v15, %v312_v14  ;;  %v311_v20 = vld [vmem:[#allocation10 + $0x20] sm:$0xff]  ;;  %v820_v21 = vpack.c.bf16 %v136_v19, %v134_v18  ;;  %v313_v22 = vld [vmem:[#allocation10 + $0x30] sm:$0xff]  ;;  %v139_v23 = vld [vmem:[#allocation8 + $0x48] sm:$0xff] }
  0x50   :  { %881 = vmatpush1.bf16.msra.mxu1 %v880_v12  ;;  %v141_v24 = vld [vmem:[#allocation8 + $0x58] sm:$0xff]  ;;  %819 = vmatprep.subr.bf16.mxu0 %v818_v16  ;;  %v884_v25 = vpack.c.bf16 %v313_v22, %v311_v20  ;;  %v316_v27 = vld [vmem:[#allocation10 + $0x48] sm:$0xff]  ;;  %v138_v29 = vld [vmem:[#allocation8 + $0x40] sm:$0xff] }
  0x51   :  { %883 = vmatprep.subr.bf16.mxu1 %v882_v17  ;;  %v822_v26 = vpack.c.bf16 %v141_v24, %v139_v23  ;;  %v318_v28 = vld [vmem:[#allocation10 + $0x58] sm:$0xff]  ;;  %v140_v31 = vld [vmem:[#allocation8 + $0x50] sm:$0xff]  ;;  %v315_v32 = vld [vmem:[#allocation10 + $0x40] sm:$0xff] }
  0x52   :  { %v886_v30 = vpack.c.bf16 %v318_v28, %v316_v27  ;;  %v317_v33 = vld [vmem:[#allocation10 + $0x50] sm:$0xff]  ;;  %v824_v34 = vpack.c.bf16 %v140_v31, %v138_v29  ;;  %v143_v35 = vld [vmem:[#allocation8 + $0x68] sm:$0xff]  ;;  %v145_v36 = vld [vmem:[#allocation8 + $0x78] sm:$0xff] }
  0x53   :  { %821 = vmatpush1.bf16.msra.mxu0 %v820_v21  ;;  %v320_v37 = vld [vmem:[#allocation10 + $0x68] sm:$0xff]  ;;  %v888_v38 = vpack.c.bf16 %v317_v33, %v315_v32  ;;  %v826_v39 = vpack.c.bf16 %v145_v36, %v143_v35  ;;  %v322_v40 = vld [vmem:[#allocation10 + $0x78] sm:$0xff]  ;;  %v142_v41 = vld [vmem:[#allocation8 + $0x60] sm:$0xff] }
  0x54   :  { %885 = vmatpush1.bf16.msra.mxu1 %v884_v25  ;;  %823 = vmatprep.subr.bf16.mxu0 %v822_v26  ;;  %v144_v42 = vld [vmem:[#allocation8 + $0x70] sm:$0xff]  ;;  %v890_v43 = vpack.c.bf16 %v322_v40, %v320_v37  ;;  %v319_v44 = vld [vmem:[#allocation10 + $0x60] sm:$0xff]  ;;  %v147_v46 = vld [vmem:[#allocation8 + $0x88] sm:$0xff] }
  0x55   :  { %887 = vmatprep.subr.bf16.mxu1 %v886_v30  ;;  %v321_v45 = vld [vmem:[#allocation10 + $0x70] sm:$0xff]  ;;  %v149_v47 = vld [vmem:[#allocation8 + $0x98] sm:$0xff]  ;;  %v324_v48 = vld [vmem:[#allocation10 + $0x88] sm:$0xff]  ;;  %v828_v50 = vpack.c.bf16 %v144_v42, %v142_v41 }
  0x56   :  { %v326_v49 = vld [vmem:[#allocation10 + $0x98] sm:$0xff]  ;;  %v892_v51 = vpack.c.bf16 %v321_v45, %v319_v44  ;;  %v830_v52 = vpack.c.bf16 %v149_v47, %v147_v46  ;;  %v146_v53 = vld [vmem:[#allocation8 + $0x80] sm:$0xff]  ;;  %v148_v54 = vld [vmem:[#allocation8 + $0x90] sm:$0xff] }
  0x57   :  { %825 = vmatpush1.bf16.msra.mxu0 %v824_v34  ;;  %v323_v55 = vld [vmem:[#allocation10 + $0x80] sm:$0xff]  ;;  %v894_v56 = vpack.c.bf16 %v326_v49, %v324_v48  ;;  %v325_v57 = vld [vmem:[#allocation10 + $0x90] sm:$0xff]  ;;  %v151_v58 = vld [vmem:[#allocation8 + $0xa8] sm:$0xff]  ;;  %v832_v62 = vpack.c.bf16 %v148_v54, %v146_v53 }
  0x58   :  { %889 = vmatpush1.bf16.msra.mxu1 %v888_v38  ;;  %827 = vmatprep.subr.bf16.mxu0 %v826_v39  ;;  %v153_v59 = vld [vmem:[#allocation8 + $0xb8] sm:$0xff]  ;;  %v328_v60 = vld [vmem:[#allocation10 + $0xa8] sm:$0xff]  ;;  %v896_v63 = vpack.c.bf16 %v325_v57, %v323_v55  ;;  %v150_v1 = vld [vmem:[#allocation8 + $0xa0] sm:$0xff] }
  0x59   :  { %891 = vmatprep.subr.bf16.mxu1 %v890_v43  ;;  %v330_v61 = vld [vmem:[#allocation10 + $0xb8] sm:$0xff]  ;;  %v834_v0 = vpack.c.bf16 %v153_v59, %v151_v58  ;;  %v152_v2 = vld [vmem:[#allocation8 + $0xb0] sm:$0xff]  ;;  %v327_v3 = vld [vmem:[#allocation10 + $0xa0] sm:$0xff] }
  0x5a   :  { %v898_v4 = vpack.c.bf16 %v330_v61, %v328_v60  ;;  %v329_v5 = vld [vmem:[#allocation10 + $0xb0] sm:$0xff]  ;;  %v155_v6 = vld [vmem:[#allocation8 + $0xc8] sm:$0xff]  ;;  %v157_v7 = vld [vmem:[#allocation8 + $0xd8] sm:$0xff]  ;;  %v836_v10 = vpack.c.bf16 %v152_v2, %v150_v1 }
  0x5b   :  { %829 = vmatpush1.bf16.msra.mxu0 %v828_v50  ;;  %v332_v8 = vld [vmem:[#allocation10 + $0xc8] sm:$0xff]  ;;  %v334_v9 = vld [vmem:[#allocation10 + $0xd8] sm:$0xff]  ;;  %v900_v11 = vpack.c.bf16 %v329_v5, %v327_v3  ;;  %v838_v12 = vpack.c.bf16 %v157_v7, %v155_v6  ;;  %v154_v13 = vld [vmem:[#allocation8 + $0xc0] sm:$0xff] }
  0x5c   :  { %893 = vmatpush1.bf16.msra.mxu1 %v892_v51  ;;  %831 = vmatprep.subr.bf16.mxu0 %v830_v52  ;;  %v156_v14 = vld [vmem:[#allocation8 + $0xd0] sm:$0xff]  ;;  %v331_v15 = vld [vmem:[#allocation10 + $0xc0] sm:$0xff]  ;;  %v902_v16 = vpack.c.bf16 %v334_v9, %v332_v8  ;;  %v159_v18 = vld [vmem:[#allocation8 + $0xe8] sm:$0xff] }
  0x5d   :  { %895 = vmatprep.subr.bf16.mxu1 %v894_v56  ;;  %v333_v17 = vld [vmem:[#allocation10 + $0xd0] sm:$0xff]  ;;  %v161_v19 = vld [vmem:[#allocation8 + $0xf8] sm:$0xff]  ;;  %v336_v20 = vld [vmem:[#allocation10 + $0xe8] sm:$0xff]  ;;  %v840_v22 = vpack.c.bf16 %v156_v14, %v154_v13 }
  0x5e   :  { %v338_v21 = vld [vmem:[#allocation10 + $0xf8] sm:$0xff]  ;;  %v904_v23 = vpack.c.bf16 %v333_v17, %v331_v15  ;;  %v842_v24 = vpack.c.bf16 %v161_v19, %v159_v18  ;;  %v158_v25 = vld [vmem:[#allocation8 + $0xe0] sm:$0xff]  ;;  %v160_v26 = vld [vmem:[#allocation8 + $0xf0] sm:$0xff] }
  0x5f   :  { %833 = vmatpush1.bf16.msra.mxu0 %v832_v62  ;;  %v335_v27 = vld [vmem:[#allocation10 + $0xe0] sm:$0xff]  ;;  %v906_v28 = vpack.c.bf16 %v338_v21, %v336_v20  ;;  %v337_v29 = vld [vmem:[#allocation10 + $0xf0] sm:$0xff]  ;;  %v163_v30 = vld [vmem:[#allocation8 + $0x108] sm:$0xff]  ;;  %v844_v34 = vpack.c.bf16 %v160_v26, %v158_v25 }
  0x60   :  { %897 = vmatpush1.bf16.msra.mxu1 %v896_v63  ;;  %835 = vmatprep.subr.bf16.mxu0 %v834_v0  ;;  %v165_v31 = vld [vmem:[#allocation8 + $0x118] sm:$0xff]  ;;  %v340_v32 = vld [vmem:[#allocation10 + $0x108] sm:$0xff]  ;;  %v908_v35 = vpack.c.bf16 %v337_v29, %v335_v27  ;;  %v162_v37 = vld [vmem:[#allocation8 + $0x100] sm:$0xff] }
  0x61   :  { %899 = vmatprep.subr.bf16.mxu1 %v898_v4  ;;  %v342_v33 = vld [vmem:[#allocation10 + $0x118] sm:$0xff]  ;;  %v846_v36 = vpack.c.bf16 %v165_v31, %v163_v30  ;;  %v164_v38 = vld [vmem:[#allocation8 + $0x110] sm:$0xff]  ;;  %v339_v39 = vld [vmem:[#allocation10 + $0x100] sm:$0xff] }
  0x62   :  { %v910_v40 = vpack.c.bf16 %v342_v33, %v340_v32  ;;  %v341_v41 = vld [vmem:[#allocation10 + $0x110] sm:$0xff]  ;;  %v167_v42 = vld [vmem:[#allocation8 + $0x128] sm:$0xff]  ;;  %v169_v43 = vld [vmem:[#allocation8 + $0x138] sm:$0xff]  ;;  %v848_v46 = vpack.c.bf16 %v164_v38, %v162_v37 }
  0x63   :  { %837 = vmatpush1.bf16.msra.mxu0 %v836_v10  ;;  %v344_v44 = vld [vmem:[#allocation10 + $0x128] sm:$0xff]  ;;  %v346_v45 = vld [vmem:[#allocation10 + $0x138] sm:$0xff]  ;;  %v912_v47 = vpack.c.bf16 %v341_v41, %v339_v39  ;;  %v850_v48 = vpack.c.bf16 %v169_v43, %v167_v42  ;;  %v166_v49 = vld [vmem:[#allocation8 + $0x120] sm:$0xff] }
  0x64   :  { %901 = vmatpush1.bf16.msra.mxu1 %v900_v11  ;;  %839 = vmatprep.subr.bf16.mxu0 %v838_v12  ;;  %v168_v50 = vld [vmem:[#allocation8 + $0x130] sm:$0xff]  ;;  %v343_v51 = vld [vmem:[#allocation10 + $0x120] sm:$0xff]  ;;  %v914_v52 = vpack.c.bf16 %v346_v45, %v344_v44  ;;  %v171_v54 = vld [vmem:[#allocation8 + $0x148] sm:$0xff] }
  0x65   :  { %903 = vmatprep.subr.bf16.mxu1 %v902_v16  ;;  %v345_v53 = vld [vmem:[#allocation10 + $0x130] sm:$0xff]  ;;  %v173_v55 = vld [vmem:[#allocation8 + $0x158] sm:$0xff]  ;;  %v348_v56 = vld [vmem:[#allocation10 + $0x148] sm:$0xff]  ;;  %v852_v58 = vpack.c.bf16 %v168_v50, %v166_v49 }
  0x66   :  { %v350_v57 = vld [vmem:[#allocation10 + $0x158] sm:$0xff]  ;;  %v916_v59 = vpack.c.bf16 %v345_v53, %v343_v51  ;;  %v854_v60 = vpack.c.bf16 %v173_v55, %v171_v54  ;;  %v170_v61 = vld [vmem:[#allocation8 + $0x140] sm:$0xff]  ;;  %v172_v62 = vld [vmem:[#allocation8 + $0x150] sm:$0xff] }
  0x67   :  { %841 = vmatpush1.bf16.msra.mxu0 %v840_v22  ;;  %v347_v63 = vld [vmem:[#allocation10 + $0x140] sm:$0xff]  ;;  %v918_v0 = vpack.c.bf16 %v350_v57, %v348_v56  ;;  %v349_v1 = vld [vmem:[#allocation10 + $0x150] sm:$0xff]  ;;  %v175_v2 = vld [vmem:[#allocation8 + $0x168] sm:$0xff]  ;;  %v856_v6 = vpack.c.bf16 %v172_v62, %v170_v61 }
  0x68   :  { %905 = vmatpush1.bf16.msra.mxu1 %v904_v23  ;;  %843 = vmatprep.subr.bf16.mxu0 %v842_v24  ;;  %v177_v3 = vld [vmem:[#allocation8 + $0x178] sm:$0xff]  ;;  %v352_v4 = vld [vmem:[#allocation10 + $0x168] sm:$0xff]  ;;  %v174_v7 = vld [vmem:[#allocation8 + $0x160] sm:$0xff]  ;;  %v920_v8 = vpack.c.bf16 %v349_v1, %v347_v63 }
  0x69   :  { %907 = vmatprep.subr.bf16.mxu1 %v906_v28  ;;  %v354_v5 = vld [vmem:[#allocation10 + $0x178] sm:$0xff]  ;;  %v858_v9 = vpack.c.bf16 %v177_v3, %v175_v2  ;;  %v176_v10 = vld [vmem:[#allocation8 + $0x170] sm:$0xff]  ;;  %v351_v11 = vld [vmem:[#allocation10 + $0x160] sm:$0xff] }
  0x6a   :  { %v353_v12 = vld [vmem:[#allocation10 + $0x170] sm:$0xff]  ;;  %v922_v13 = vpack.c.bf16 %v354_v5, %v352_v4  ;;  %v179_v14 = vld [vmem:[#allocation8 + $0x188] sm:$0xff]  ;;  %v181_v15 = vld [vmem:[#allocation8 + $0x198] sm:$0xff]  ;;  %v860_v19 = vpack.c.bf16 %v176_v10, %v174_v7 }
  0x6b   :  { %845 = vmatpush1.bf16.msra.mxu0 %v844_v34  ;;  %v1344_v16 = vld [vmem:[#allocation5 + $0x8] sm:$0xff]  ;;  %v358_v18 = vld [vmem:[#allocation10 + $0x198] sm:$0xff]  ;;  %v924_v20 = vpack.c.bf16 %v353_v12, %v351_v11  ;;  %v862_v21 = vpack.c.bf16 %v181_v15, %v179_v14  ;;  %v178_v22 = vld [vmem:[#allocation8 + $0x180] sm:$0xff] }
  0x6c   :  { %909 = vmatpush1.bf16.msra.mxu1 %v908_v35  ;;  %847 = vmatprep.subr.bf16.mxu0 %v846_v36  ;;  %v356_v17 = vld [vmem:[#allocation10 + $0x188] sm:$0xff]  ;;  %v180_v23 = vld [vmem:[#allocation8 + $0x190] sm:$0xff]  ;;  %v355_v24 = vld [vmem:[#allocation10 + $0x180] sm:$0xff] }
  0x6d   :  { %911 = vmatprep.subr.bf16.mxu1 %v910_v40  ;;  %258 = vmatprep.mubr.f32.mxu0 %v1344_v16  ;;  %v926_v25 = vpack.c.bf16 %v358_v18, %v356_v17  ;;  %v357_v26 = vld [vmem:[#allocation10 + $0x190] sm:$0xff]  ;;  %v183_v27 = vld [vmem:[#allocation8 + $0x1a8] sm:$0xff]  ;;  %v185_v28 = vld [vmem:[#allocation8 + $0x1b8] sm:$0xff]  ;;  %v864_v31 = vpack.c.bf16 %v180_v23, %v178_v22 }
  0x6e   :  { %435 = vmatprep.mubr.f32.mxu1 %v1344_v16  ;;  %v360_v29 = vld [vmem:[#allocation10 + $0x1a8] sm:$0xff]  ;;  %v362_v30 = vld [vmem:[#allocation10 + $0x1b8] sm:$0xff]  ;;  %v928_v32 = vpack.c.bf16 %v357_v26, %v355_v24  ;;  %v866_v33 = vpack.c.bf16 %v185_v28, %v183_v27  ;;  %v182_v34 = vld [vmem:[#allocation8 + $0x1a0] sm:$0xff] }
  0x6f   :  { %849 = vmatpush1.bf16.msra.mxu0 %v848_v46  ;;  %v184_v35 = vld [vmem:[#allocation8 + $0x1b0] sm:$0xff]  ;;  %v359_v36 = vld [vmem:[#allocation10 + $0x1a0] sm:$0xff]  ;;  %v930_v37 = vpack.c.bf16 %v362_v30, %v360_v29  ;;  %v187_v39 = vld [vmem:[#allocation8 + $0x1c8] sm:$0xff] }
  0x70   :  { %913 = vmatpush1.bf16.msra.mxu1 %v912_v47  ;;  %851 = vmatprep.subr.bf16.mxu0 %v850_v48  ;;  %v361_v38 = vld [vmem:[#allocation10 + $0x1b0] sm:$0xff]  ;;  %v189_v40 = vld [vmem:[#allocation8 + $0x1d8] sm:$0xff]  ;;  %v364_v41 = vld [vmem:[#allocation10 + $0x1c8] sm:$0xff]  ;;  %v868_v43 = vpack.c.bf16 %v184_v35, %v182_v34 }
  0x71   :  { %915 = vmatprep.subr.bf16.mxu1 %v914_v52  ;;  %v366_v42 = vld [vmem:[#allocation10 + $0x1d8] sm:$0xff]  ;;  %v932_v44 = vpack.c.bf16 %v361_v38, %v359_v36  ;;  %v870_v45 = vpack.c.bf16 %v189_v40, %v187_v39  ;;  %v186_v46 = vld [vmem:[#allocation8 + $0x1c0] sm:$0xff]  ;;  %v188_v47 = vld [vmem:[#allocation8 + $0x1d0] sm:$0xff] }
  0x72   :  { %v363_v48 = vld [vmem:[#allocation10 + $0x1c0] sm:$0xff]  ;;  %v934_v49 = vpack.c.bf16 %v366_v42, %v364_v41  ;;  %v365_v50 = vld [vmem:[#allocation10 + $0x1d0] sm:$0xff]  ;;  %v191_v51 = vld [vmem:[#allocation8 + $0x1e8] sm:$0xff]  ;;  %v872_v55 = vpack.c.bf16 %v188_v47, %v186_v46 }
  0x73   :  { %853 = vmatpush1.bf16.msra.mxu0 %v852_v58  ;;  %v193_v52 = vld [vmem:[#allocation8 + $0x1f8] sm:$0xff]  ;;  %v368_v53 = vld [vmem:[#allocation10 + $0x1e8] sm:$0xff]  ;;  %v936_v56 = vpack.c.bf16 %v365_v50, %v363_v48  ;;  %v190_v58 = vld [vmem:[#allocation8 + $0x1e0] sm:$0xff] }
  0x74   :  { %917 = vmatpush1.bf16.msra.mxu1 %v916_v59  ;;  %855 = vmatprep.subr.bf16.mxu0 %v854_v60  ;;  %v370_v54 = vld [vmem:[#allocation10 + $0x1f8] sm:$0xff]  ;;  %v874_v57 = vpack.c.bf16 %v193_v52, %v191_v51  ;;  %v192_v59 = vld [vmem:[#allocation8 + $0x1f0] sm:$0xff]  ;;  %v367_v60 = vld [vmem:[#allocation10 + $0x1e0] sm:$0xff] }
  0x75   :  { %919 = vmatprep.subr.bf16.mxu1 %v918_v0  ;;  %v938_v61 = vpack.c.bf16 %v370_v54, %v368_v53  ;;  %v369_v62 = vld [vmem:[#allocation10 + $0x1f0] sm:$0xff]  ;;  %v485_v63 = vld [vmem:[#allocation11 + $0x8] sm:$0xff]  ;;  %v487_v0 = vld [vmem:[#allocation11 + $0x18] sm:$0xff]  ;;  %v876_v1 = vpack.c.bf16 %v192_v59, %v190_v58 }
  0x76   :  { %v940_v2 = vpack.c.bf16 %v369_v62, %v367_v60  ;;  %v942_v3 = vpack.c.bf16 %v487_v0, %v485_v63  ;;  %v484_v4 = vld [vmem:[#allocation11] sm:$0xff]  ;;  %v486_v5 = vld [vmem:[#allocation11 + $0x10] sm:$0xff]  ;;  %v491_v7 = vld [vmem:[#allocation11 + $0x38] sm:$0xff] }
  0x77   :  { %857 = vmatpush1.bf16.msra.mxu0 %v856_v6  ;;  %v489_v6 = vld [vmem:[#allocation11 + $0x28] sm:$0xff]  ;;  %v488_v11 = vld [vmem:[#allocation11 + $0x20] sm:$0xff]  ;;  %v490_v12 = vld [vmem:[#allocation11 + $0x30] sm:$0xff] }
  0x78   :  { %921 = vmatpush1.bf16.msra.mxu1 %v920_v8  ;;  %859 = vmatprep.subr.bf16.mxu0 %v858_v9  ;;  %v1348_v8 = vld [vmem:[#allocation5] sm:$0xff]  ;;  %v944_v9 = vpack.c.bf16 %v486_v5, %v484_v4  ;;  %v946_v10 = vpack.c.bf16 %v491_v7, %v489_v6  ;;  %v495_v14 = vld [vmem:[#allocation11 + $0x58] sm:$0xff]  ;;  %v948_v17 = vpack.c.bf16 %v490_v12, %v488_v11  ;;  %v1354_v18 = vld [vmem:[#allocation5 + $0x10] sm:$0xff] }
  0x79   :  { %923 = vmatprep.subr.bf16.mxu1 %v922_v13  ;;  %v493_v13 = vld [vmem:[#allocation11 + $0x48] sm:$0xff]  ;;  %v1351_v15 = vld [vmem:[#allocation5 + $0x18] sm:$0xff]  ;;  %v1360_v26 = vld [vmem:[#allocation5 + $0x20] sm:$0xff] }
  0x7a   :  { %v497_v22 = vld [vmem:[#allocation11 + $0x68] sm:$0xff]  ;;  %v499_v23 = vld [vmem:[#allocation11 + $0x78] sm:$0xff]  ;;  %v496_v28 = vld [vmem:[#allocation11 + $0x60] sm:$0xff] }
  0x7b   :  { %861 = vmatpush1.bf16.msra.mxu0 %v860_v19  ;;  %v950_v19 = vpack.c.bf16 %v495_v14, %v493_v13  ;;  %v119_v24 = vld [vmem:[#allocation5 + $0x28] sm:$0xff]  ;;  %v954_v27 = vpack.c.bf16 %v499_v23, %v497_v22  ;;  %v498_v29 = vld [vmem:[#allocation11 + $0x70] sm:$0xff]  ;;  %v500_v36 = vld [vmem:[#allocation11 + $0x80] sm:$0xff] }
  0x7c   :  { %925 = vmatpush1.bf16.msra.mxu1 %v924_v20  ;;  %863 = vmatprep.subr.bf16.mxu0 %v862_v21  ;;  %v492_v20 = vld [vmem:[#allocation11 + $0x40] sm:$0xff]  ;;  %v494_v21 = vld [vmem:[#allocation11 + $0x50] sm:$0xff]  ;;  %v501_v30 = vld [vmem:[#allocation11 + $0x88] sm:$0xff] }
  0x7d   :  { %927 = vmatprep.subr.bf16.mxu1 %v926_v25  ;;  %v952_v25 = vpack.c.bf16 %v494_v21, %v492_v20  ;;  %v1366_v34 = vld [vmem:[#allocation5 + $0x30] sm:$0xff]  ;;  %v505_v38 = vld [vmem:[#allocation11 + $0xa8] sm:$0xff]  ;;  %v507_v39 = vld [vmem:[#allocation11 + $0xb8] sm:$0xff] }
  0x7e   :  { %v962_v41 = vpack.c.bf16 %v507_v39, %v505_v38  ;;  %v504_v42 = vld [vmem:[#allocation11 + $0xa0] sm:$0xff]  ;;  %v513_v50 = vld [vmem:[#allocation11 + $0xe8] sm:$0xff]  ;;  %v515_v51 = vld [vmem:[#allocation11 + $0xf8] sm:$0xff] }
  0x7f   :  { %865 = vmatpush1.bf16.msra.mxu0 %v864_v31  ;;  %v503_v31 = vld [vmem:[#allocation11 + $0x98] sm:$0xff]  ;;  %v508_v48 = vld [vmem:[#allocation11 + $0xc0] sm:$0xff]  ;;  %v970_v53 = vpack.c.bf16 %v515_v51, %v513_v50  ;;  %v518_v60 = vld [vmem:[#allocation11 + $0x110] sm:$0xff] }
  0x80   :  { %929 = vmatpush1.bf16.msra.mxu1 %v928_v32  ;;  %867 = vmatprep.subr.bf16.mxu0 %v866_v33  ;;  %v1363_v32 = vld [vmem:[#allocation5 + $0x38] sm:$0xff]  ;;  %v956_v33 = vpack.c.bf16 %v498_v29, %v496_v28  ;;  %v958_v35 = vpack.c.bf16 %v503_v31, %v501_v30  ;;  %v512_v54 = vld [vmem:[#allocation11 + $0xe0] sm:$0xff]  ;;  %v538_v31 = vld [vmem:[#allocation11 + $0x1b0] sm:$0xff] }
  0x81   :  { %931 = vmatprep.subr.bf16.mxu1 %v930_v37  ;;  %v502_v37 = vld [vmem:[#allocation11 + $0x90] sm:$0xff]  ;;  %v516_v59 = vld [vmem:[#allocation11 + $0x100] sm:$0xff]  ;;  %v523_v62 = vld [vmem:[#allocation11 + $0x138] sm:$0xff] }
  0x82   :  { %v960_v40 = vpack.c.bf16 %v502_v37, %v500_v36  ;;  %v976_v63 = vpack.c.bf16 %v518_v60, %v516_v59  ;;  %v527_v4 = vld [vmem:[#allocation11 + $0x158] sm:$0xff]  ;;  %v524_v7 = vld [vmem:[#allocation11 + $0x140] sm:$0xff]  ;;  %v542_v39 = vld [vmem:[#allocation11 + $0x1d0] sm:$0xff] }
  0x83   :  { %869 = vmatpush1.bf16.msra.mxu0 %v868_v43  ;;  %v506_v43 = vld [vmem:[#allocation11 + $0xb0] sm:$0xff]  ;;  %v531_v11 = vld [vmem:[#allocation11 + $0x178] sm:$0xff]  ;;  %v528_v14 = vld [vmem:[#allocation11 + $0x160] sm:$0xff] }
  0x84   :  { %933 = vmatpush1.bf16.msra.mxu1 %v932_v44  ;;  %871 = vmatprep.subr.bf16.mxu0 %v870_v45  ;;  %v509_v44 = vld [vmem:[#allocation11 + $0xc8] sm:$0xff]  ;;  %v511_v45 = vld [vmem:[#allocation11 + $0xd8] sm:$0xff]  ;;  %v964_v46 = vpack.c.bf16 %v506_v43, %v504_v42  ;;  %v532_v23 = vld [vmem:[#allocation11 + $0x180] sm:$0xff] }
  0x85   :  { %935 = vmatprep.subr.bf16.mxu1 %v934_v49  ;;  %v966_v47 = vpack.c.bf16 %v511_v45, %v509_v44  ;;  %v510_v49 = vld [vmem:[#allocation11 + $0xd0] sm:$0xff]  ;;  %v535_v20 = vld [vmem:[#allocation11 + $0x198] sm:$0xff]  ;;  %v536_v30 = vld [vmem:[#allocation11 + $0x1a0] sm:$0xff] }
  0x86   :  { %v968_v52 = vpack.c.bf16 %v510_v49, %v508_v48  ;;  %v996_v36 = vpack.c.bf16 %v538_v31, %v536_v30  ;;  %v540_v38 = vld [vmem:[#allocation11 + $0x1c0] sm:$0xff]  ;;  %v546_v45 = vld [vmem:[#allocation11 + $0x1f0] sm:$0xff] }
  0x87   :  { %873 = vmatpush1.bf16.msra.mxu0 %v872_v55  ;;  %v514_v55 = vld [vmem:[#allocation11 + $0xf0] sm:$0xff]  ;;  %v1000_v42 = vpack.c.bf16 %v542_v39, %v540_v38  ;;  %v544_v44 = vld [vmem:[#allocation11 + $0x1e0] sm:$0xff] }
  0x88   :  { %937 = vmatpush1.bf16.msra.mxu1 %v936_v56  ;;  %875 = vmatprep.subr.bf16.mxu0 %v874_v57  ;;  %v519_v56 = vld [vmem:[#allocation11 + $0x118] sm:$0xff]  ;;  %v972_v57 = vpack.c.bf16 %v514_v55, %v512_v54  ;;  %v664_v50 = vld [vmem:[%s1454_s4] sm:$0x3]  ;;  %s1217_s4 = smov [#allocation13]  }
  0x89   :  { %939 = vmatprep.subr.bf16.mxu1 %v938_v61  ;;  %v521_v61 = vld [vmem:[#allocation11 + $0x128] sm:$0xff] }
  0x8a   :  { %v978_v0 = vpack.c.bf16 %v523_v62, %v521_v61 }
  0x8b   :  { %877 = vmatpush1.bf16.msra.mxu0 %v876_v1  ;;  %v520_v1 = vld [vmem:[#allocation11 + $0x120] sm:$0xff] }
  0x8c   :  { %941 = vmatpush1.bf16.msra.mxu1 %v940_v2  ;;  %943 = vmatprep.subr.bf16.mxu0 %v942_v3  ;;  %v522_v2 = vld [vmem:[#allocation11 + $0x130] sm:$0xff] }
  0x8d   :  { %1006 = vmatprep.subr.bf16.mxu1 %v942_v3  ;;  %v525_v3 = vld [vmem:[#allocation11 + $0x148] sm:$0xff]  ;;  %v980_v5 = vpack.c.bf16 %v522_v2, %v520_v1 }
  0x8e   :  { %259 = vmatmul.mubr.f32.vlgmr.msra.gmra.mrb[0].mxu0 %v1348_v8  ;;  %v982_v6 = vpack.c.bf16 %v527_v4, %v525_v3 }
  0x8f   :  { %436 = vmatmul.mubr.f32.vlgmr.msra.gmra.mrb[0].mxu1 %v1348_v8  ;;  %945 = vmatpush1.bf16.msra.mxu0 %v944_v9 }
  0x90   :  { %1022 = vmatpush1.bf16.msra.mxu1 %v944_v9  ;;  %947 = vmatprep.subr.bf16.mxu0 %v946_v10  ;;  %v526_v9 = vld [vmem:[#allocation11 + $0x150] sm:$0xff] }
  0x91   :  { %1007 = vmatprep.subr.bf16.mxu1 %v946_v10  ;;  %264 = vmatprep.mubr.f32.mxu0 %v1351_v15  ;;  %v529_v10 = vld [vmem:[#allocation11 + $0x168] sm:$0xff]  ;;  %v984_v12 = vpack.c.bf16 %v526_v9, %v524_v7 }
  0x92   :  { %441 = vmatprep.mubr.f32.mxu1 %v1351_v15  ;;  %265 = vmatmul.mubr.f32.gmra.mrb[2].mxu0 %v1354_v18  ;;  %v986_v13 = vpack.c.bf16 %v531_v11, %v529_v10 }
  0x93   :  { %949 = vmatpush1.bf16.msra.mxu0 %v948_v17  ;;  %442 = vmatmul.mubr.f32.gmra.mrb[2].mxu1 %v1354_v18 }
  0x94   :  { %1023 = vmatpush1.bf16.msra.mxu1 %v948_v17  ;;  %951 = vmatprep.subr.bf16.mxu0 %v950_v19  ;;  %v530_v17 = vld [vmem:[#allocation11 + $0x170] sm:$0xff] }
  0x95   :  { %1008 = vmatprep.subr.bf16.mxu1 %v950_v19  ;;  %270 = vmatprep.mubr.f32.mxu0 %v119_v24  ;;  %v533_v19 = vld [vmem:[#allocation11 + $0x188] sm:$0xff]  ;;  %v988_v21 = vpack.c.bf16 %v530_v17, %v528_v14 }
  0x96   :  { %447 = vmatprep.mubr.f32.mxu1 %v119_v24  ;;  %271 = vmatmul.mubr.f32.gmra.mrb[4].mxu0 %v1360_v26  ;;  %v990_v22 = vpack.c.bf16 %v535_v20, %v533_v19 }
  0x97   :  { %953 = vmatpush1.bf16.msra.mxu0 %v952_v25  ;;  %448 = vmatmul.mubr.f32.gmra.mrb[4].mxu1 %v1360_v26 }
  0x98   :  { %1024 = vmatpush1.bf16.msra.mxu1 %v952_v25  ;;  %955 = vmatprep.subr.bf16.mxu0 %v954_v27  ;;  %v537_v25 = vld [vmem:[#allocation11 + $0x1a8] sm:$0xff] }
  0x99   :  { %1009 = vmatprep.subr.bf16.mxu1 %v954_v27  ;;  %276 = vmatprep.mubr.f32.mxu0 %v1363_v32  ;;  %v539_v27 = vld [vmem:[#allocation11 + $0x1b8] sm:$0xff] }
  0x9a   :  { %453 = vmatprep.mubr.f32.mxu1 %v1363_v32  ;;  %277 = vmatmul.mubr.f32.gmra.mrb[6].mxu0 %v1366_v34  ;;  %v994_v29 = vpack.c.bf16 %v539_v27, %v537_v25 }
  0x9b   :  { %957 = vmatpush1.bf16.msra.mxu0 %v956_v33  ;;  %454 = vmatmul.mubr.f32.gmra.mrb[6].mxu1 %v1366_v34 }
  0x9c   :  { %1025 = vmatpush1.bf16.msra.mxu1 %v956_v33  ;;  %959 = vmatprep.subr.bf16.mxu0 %v958_v35  ;;  %v541_v33 = vld [vmem:[#allocation11 + $0x1c8] sm:$0xff] }
  0x9d   :  { %1010 = vmatprep.subr.bf16.mxu1 %v958_v35  ;;  %612 = vmatprep.mubr.f32.mxu0 %v1344_v16  ;;  %v517_v16 = vld [vmem:[#allocation11 + $0x108] sm:$0xff]  ;;  %v543_v35 = vld [vmem:[#allocation11 + $0x1d8] sm:$0xff] }
  0x9e   :  { %624 = vmatprep.mubr.f32.mxu1 %v119_v24  ;;  %v974_v58 = vpack.c.bf16 %v519_v56, %v517_v16  ;;  %v534_v24 = vld [vmem:[#allocation11 + $0x190] sm:$0xff]  ;;  %v998_v37 = vpack.c.bf16 %v543_v35, %v541_v33 }
  0x9f   :  { %961 = vmatpush1.bf16.msra.mxu0 %v960_v40  ;;  %v992_v28 = vpack.c.bf16 %v534_v24, %v532_v23 }
  0xa0   :  { %1026 = vmatpush1.bf16.msra.mxu1 %v960_v40  ;;  %963 = vmatprep.subr.bf16.mxu0 %v962_v41  ;;  %v545_v40 = vld [vmem:[#allocation11 + $0x1e8] sm:$0xff] }
  0xa1   :  { %1011 = vmatprep.subr.bf16.mxu1 %v962_v41  ;;  %v547_v41 = vld [vmem:[#allocation11 + $0x1f8] sm:$0xff] }
  0xa2   :  { %v1002_v43 = vpack.c.bf16 %v547_v41, %v545_v40 }
  0xa3   :  { %965 = vmatpush1.bf16.msra.mxu0 %v964_v46 }
  0xa4   :  { %1027 = vmatpush1.bf16.msra.mxu1 %v964_v46  ;;  %967 = vmatprep.subr.bf16.mxu0 %v966_v47  ;;  %v1004_v46 = vpack.c.bf16 %v546_v45, %v544_v44 }
  0xa5   :  { %1012 = vmatprep.subr.bf16.mxu1 %v966_v47  ;;  %v666_v47 = vlaneseq }
  0xa7   :  { %969 = vmatpush1.bf16.msra.mxu0 %v968_v52  ;;  %v667_v48 = vshrl.u32 %v666_v47, 7 }
  0xa8   :  { %1028 = vmatpush1.bf16.msra.mxu1 %v968_v52  ;;  %971 = vmatprep.subr.bf16.mxu0 %v970_v53 }
  0xa9   :  { %1013 = vmatprep.subr.bf16.mxu1 %v970_v53  ;;  %v1379_v49 = vsub.s32 0, %v667_v48  ;;  %v1384_v51 = vsub.s32 1, %v667_v48 }
  0xab   :  { %973 = vmatpush1.bf16.msra.mxu0 %v972_v57 }
  0xac   :  { %1029 = vmatpush1.bf16.msra.mxu1 %v972_v57  ;;  %975 = vmatprep.subr.bf16.mxu0 %v974_v58 }
  0xad   :  { %1014 = vmatprep.subr.bf16.mxu1 %v974_v58 }
  0xaf   :  { %977 = vmatpush1.bf16.msra.mxu0 %v976_v63 }
  0xb0   :  { %1030 = vmatpush1.bf16.msra.mxu1 %v976_v63  ;;  %979 = vmatprep.subr.bf16.mxu0 %v978_v0 }
  0xb1   :  { %1015 = vmatprep.subr.bf16.mxu1 %v978_v0 }
  0xb3   :  { %981 = vmatpush1.bf16.msra.mxu0 %v980_v5 }
  0xb4   :  { %1031 = vmatpush1.bf16.msra.mxu1 %v980_v5  ;;  %983 = vmatprep.subr.bf16.mxu0 %v982_v6 }
  0xb5   :  { %1016 = vmatprep.subr.bf16.mxu1 %v982_v6 }
  0xb7   :  { %985 = vmatpush1.bf16.msra.mxu0 %v984_v12 }
  0xb8   :  { %1032 = vmatpush1.bf16.msra.mxu1 %v984_v12  ;;  %987 = vmatprep.subr.bf16.mxu0 %v986_v13 }
  0xb9   :  { %1017 = vmatprep.subr.bf16.mxu1 %v986_v13 }
  0xbb   :  { %989 = vmatpush1.bf16.msra.mxu0 %v988_v21 }
  0xbc   :  { %1033 = vmatpush1.bf16.msra.mxu1 %v988_v21  ;;  %991 = vmatprep.subr.bf16.mxu0 %v990_v22 }
  0xbd   :  { %1018 = vmatprep.subr.bf16.mxu1 %v990_v22 }
  0xbf   :  { %993 = vmatpush1.bf16.msra.mxu0 %v992_v28 }
  0xc0   :  { %1034 = vmatpush1.bf16.msra.mxu1 %v992_v28  ;;  %995 = vmatprep.subr.bf16.mxu0 %v994_v29 }
  0xc1   :  { %1019 = vmatprep.subr.bf16.mxu1 %v994_v29 }
  0xc3   :  { %997 = vmatpush1.bf16.msra.mxu0 %v996_v36 }
  0xc4   :  { %1035 = vmatpush1.bf16.msra.mxu1 %v996_v36  ;;  %999 = vmatprep.subr.bf16.mxu0 %v998_v37 }
  0xc5   :  { %1020 = vmatprep.subr.bf16.mxu1 %v998_v37 }
  0xc7   :  { %1001 = vmatpush1.bf16.msra.mxu0 %v1000_v42 }
  0xc8   :  { %1036 = vmatpush1.bf16.msra.mxu1 %v1000_v42  ;;  %1003 = vmatprep.subr.bf16.mxu0 %v1002_v43 }
  0xc9   :  { %1021 = vmatprep.subr.bf16.mxu1 %v1002_v43 }
  0xcb   :  { %1005 = vmatpush1.bf16.msra.mxu0 %v1004_v46 }
  0xcc   :  { %1037 = vmatpush1.bf16.msra.mxu1 %v1004_v46 }
  0xce   :  { %613 = vmatmul.mubr.f32.vlgmr.msra.gmra.mrb[8].mxu0 %v1348_v8  ;;  %v700_v8 = vld [vmem:[%s1455_s5] sm:$0x3]  ;;  %s769_s5 = sshll.u32 %s1217_s4, 4  ;;  %s770_s5 = int_to_ptr.vmem [resolvable:$true] %s769_s5 }
  0xcf   :  { %625 = vmatmul.mubr.f32.vlgmr.msra.gmra.mrb[8].mxu1 %v1360_v26  ;;  %618 = vmatprep.mubr.f32.mxu0 %v1351_v15  ;;  %v669_v15 = vrot.slane %v664_v50, %v1379_v49  ;;  %v673_v26 = vrot.slane %v664_v50, %v1384_v51  ;;  %s1135_s23 = scalar_lea.vmem %s770_s5, 1024  ;;  %p1140_p5 = scmp.lt.s32.totalorder %s770_s5, %s770_s5 }
  0xd0   :  { %630 = vmatprep.mubr.f32.mxu1 %v1363_v32  ;;  %v709_v32 = vrot.slane %v700_v8, %v1384_v51  ;;  %p1136_p4 = scmp.ne.s32.totalorder %s770_s5, %s1135_s23  ;;  %p1141_p6 = scmp.lt.s32.totalorder %s1135_s23, %s1135_s23 }
  0xd2   :  { %619 = vmatmul.mubr.f32.gmra.mrb[10].mxu0 %v1354_v18  ;;  %v705_v18 = vrot.slane %v700_v8, %v1379_v49  ;;  %p1142_p7 = por %p1141_p6, %p1140_p5 }
  0xd3   :  { %631 = vmatmul.mubr.f32.gmra.mrb[10].mxu1 %v1366_v34 }
  0xd4   :  { %p1143_p8 = pnand %p1142_p7, %p1136_p4 }
 0x161   :  { %v260_v34 = vpop.f32.mrb[0].mxu0 }
 0x162   :  { %v676_v52 = vadd.f32 %v669_v15, %v260_v34  ;;  %v437_v53 = vpop.f32.mrb[0].mxu1  ;;  %v262_v54 = vpop.f32.mrb[1].mxu0 }
 0x163   :  { %v712_v55 = vadd.f32 %v705_v18, %v437_v53  ;;  %v677_v16 = vadd.f32 %v673_v26, %v262_v54  ;;  %v439_v56 = vpop.f32.mrb[1].mxu1 }
 0x164   :  { %684 = vst [vmem:[#allocation13] sm:$0xff] %v676_v52  ;;  %v713_v57 = vadd.f32 %v709_v32, %v439_v56 }
 0x165   :  { %720 = vst [vmem:[#allocation14] sm:$0xff] %v712_v55  ;;  %685 = vst [vmem:[#allocation13 + $0x8] sm:$0xff] %v677_v16  ;;  %v266_v58 = vpop.f32.mrb[2].mxu0 }
 0x166   :  { %721 = vst [vmem:[#allocation14 + $0x8] sm:$0xff] %v713_v57  ;;  %v678_v59 = vadd.f32 %v669_v15, %v266_v58  ;;  %v443_v60 = vpop.f32.mrb[2].mxu1  ;;  %v268_v61 = vpop.f32.mrb[3].mxu0 }
 0x167   :  { %v714_v62 = vadd.f32 %v705_v18, %v443_v60  ;;  %v679_v63 = vadd.f32 %v673_v26, %v268_v61  ;;  %v445_v0 = vpop.f32.mrb[3].mxu1 }
 0x168   :  { %686 = vst [vmem:[#allocation13 + $0x10] sm:$0xff] %v678_v59  ;;  %v715_v1 = vadd.f32 %v709_v32, %v445_v0 }
 0x169   :  { %722 = vst [vmem:[#allocation14 + $0x10] sm:$0xff] %v714_v62  ;;  %687 = vst [vmem:[#allocation13 + $0x18] sm:$0xff] %v679_v63  ;;  %v272_v2 = vpop.f32.mrb[4].mxu0 }
 0x16a   :  { %723 = vst [vmem:[#allocation14 + $0x18] sm:$0xff] %v715_v1  ;;  %v680_v3 = vadd.f32 %v669_v15, %v272_v2  ;;  %v449_v4 = vpop.f32.mrb[4].mxu1  ;;  %v274_v5 = vpop.f32.mrb[5].mxu0 }
 0x16b   :  { %v716_v6 = vadd.f32 %v705_v18, %v449_v4  ;;  %v681_v7 = vadd.f32 %v673_v26, %v274_v5  ;;  %v451_v9 = vpop.f32.mrb[5].mxu1 }
 0x16c   :  { %688 = vst [vmem:[#allocation13 + $0x20] sm:$0xff] %v680_v3  ;;  %v717_v10 = vadd.f32 %v709_v32, %v451_v9 }
 0x16d   :  { %724 = vst [vmem:[#allocation14 + $0x20] sm:$0xff] %v716_v6  ;;  %689 = vst [vmem:[#allocation13 + $0x28] sm:$0xff] %v681_v7  ;;  %v278_v11 = vpop.f32.mrb[6].mxu0 }
 0x16e   :  { %725 = vst [vmem:[#allocation14 + $0x28] sm:$0xff] %v717_v10  ;;  %v682_v12 = vadd.f32 %v669_v15, %v278_v11  ;;  %v455_v13 = vpop.f32.mrb[6].mxu1  ;;  %v280_v14 = vpop.f32.mrb[7].mxu0 }
 0x16f   :  { %v718_v17 = vadd.f32 %v705_v18, %v455_v13  ;;  %v683_v19 = vadd.f32 %v673_v26, %v280_v14  ;;  %v457_v20 = vpop.f32.mrb[7].mxu1 }
 0x170   :  { %690 = vst [vmem:[#allocation13 + $0x30] sm:$0xff] %v682_v12  ;;  %v719_v21 = vadd.f32 %v709_v32, %v457_v20 }
 0x171   :  { %726 = vst [vmem:[#allocation14 + $0x30] sm:$0xff] %v718_v17  ;;  %691 = vst [vmem:[#allocation13 + $0x38] sm:$0xff] %v683_v19 }
 0x172   :  { %727 = vst [vmem:[#allocation14 + $0x38] sm:$0xff] %v719_v21 }
 0x173   :  { %1146 = shalt.err (!%p1143_p8)
}
 0x174   :  { %s1147_s26 = scalar_lea.hbm %s1457_s7, 1024 }
 0x175   :  { %p1148_p9 = scmp.ne.s32.totalorder %s1457_s7, %s1147_s26  ;;  %p1151_p10 = scmp.lt.u32.totalorder %s1147_s26, %s1457_s7 }
 0x177   :  { %p1153_p11 = pnand %p1151_p10, %p1148_p9 }
 0x179   :  { %1156 = shalt.err (!%p1153_p11)
}
 0x17a   :  { %775 = dma.vmem_to_hbm [thread:$0]  %s770_s5, 1024, %s1457_s7, [#allocation7], %s1213_s21, %s1213_s21, %s1214_s22  }
 0x17b   :  { %s1157_s11 = scalar_lea.vmem %s1393_s20, 1024  ;;  %p1162_p13 = scmp.lt.s32.totalorder %s1393_s20, %s1393_s20 }
 0x17c   :  { %p1158_p12 = scmp.ne.s32.totalorder %s1393_s20, %s1157_s11  ;;  %p1163_p0 = scmp.lt.s32.totalorder %s1157_s11, %s1157_s11 }
 0x17e   :  { %p1164_p1 = por %p1163_p0, %p1162_p13 }
 0x180   :  { %p1165_p2 = pnand %p1164_p1, %p1158_p12 }
 0x182   :  { %1168 = shalt.err (!%p1165_p2)
}
 0x183   :  { %s1169_s10 = scalar_lea.hbm %s1458_s8, 1024 }
 0x184   :  { %p1170_p3 = scmp.ne.s32.totalorder %s1458_s8, %s1169_s10  ;;  %p1173_p4 = scmp.lt.u32.totalorder %s1169_s10, %s1458_s8 }
 0x186   :  { %p1175_p5 = pnand %p1173_p4, %p1170_p3 }
 0x188   :  { %1178 = shalt.err (!%p1175_p5)
}
 0x189   :  { %787 = dma.vmem_to_hbm [thread:$0]  %s1393_s20, 1024, %s1458_s8, [#allocation15], %s1213_s21, %s1213_s21, %s1214_s22  }
 0x18a   :  { %v736_v22 = vld [vmem:[%s1456_s6] sm:$0x3]  ;;  %s1219_s8 = smov [#allocation16]  }
 0x18b   :  { %v741_v23 = vrot.slane %v736_v22, %v1379_v49  ;;  %v745_v24 = vrot.slane %v736_v22, %v1384_v51  ;;  %s793_s4 = sshll.u32 %s1219_s8, 4  ;;  %s794_s4 = int_to_ptr.vmem [resolvable:$true] %s793_s4 }
 0x18c   :  { %s1179_s6 = scalar_lea.vmem %s794_s4, 1024  ;;  %p1184_p7 = scmp.lt.s32.totalorder %s794_s4, %s794_s4 }
 0x18d   :  { %p1180_p6 = scmp.ne.s32.totalorder %s794_s4, %s1179_s6  ;;  %p1185_p8 = scmp.lt.s32.totalorder %s1179_s6, %s1179_s6 }
 0x18f   :  { %p1186_p9 = por %p1185_p8, %p1184_p7 }
 0x191   :  { %p1187_p10 = pnand %p1186_p9, %p1180_p6 }
 0x1a1   :  { %v614_v25 = vpop.f32.mrb[8].mxu0 }
 0x1a2   :  { %v748_v27 = vadd.f32 %v741_v23, %v614_v25  ;;  %v626_v28 = vpop.f32.mrb[8].mxu1  ;;  %v616_v29 = vpop.f32.mrb[9].mxu0 }
 0x1a3   :  { %v752_v30 = vadd.f32 %v741_v23, %v626_v28  ;;  %v749_v31 = vadd.f32 %v745_v24, %v616_v29  ;;  %v628_v33 = vpop.f32.mrb[9].mxu1 }
 0x1a4   :  { %756 = vst [vmem:[#allocation16] sm:$0xff] %v748_v27  ;;  %v753_v35 = vadd.f32 %v745_v24, %v628_v33 }
 0x1a5   :  { %760 = vst [vmem:[#allocation16 + $0x20] sm:$0xff] %v752_v30  ;;  %757 = vst [vmem:[#allocation16 + $0x8] sm:$0xff] %v749_v31  ;;  %v620_v36 = vpop.f32.mrb[10].mxu0 }
 0x1a6   :  { %761 = vst [vmem:[#allocation16 + $0x28] sm:$0xff] %v753_v35  ;;  %v750_v37 = vadd.f32 %v741_v23, %v620_v36  ;;  %v632_v38 = vpop.f32.mrb[10].mxu1  ;;  %v622_v39 = vpop.f32.mrb[11].mxu0 }
 0x1a7   :  { %v754_v40 = vadd.f32 %v741_v23, %v632_v38  ;;  %v751_v41 = vadd.f32 %v745_v24, %v622_v39  ;;  %v634_v42 = vpop.f32.mrb[11].mxu1 }
 0x1a8   :  { %758 = vst [vmem:[#allocation16 + $0x10] sm:$0xff] %v750_v37  ;;  %v755_v43 = vadd.f32 %v745_v24, %v634_v42 }
 0x1a9   :  { %762 = vst [vmem:[#allocation16 + $0x30] sm:$0xff] %v754_v40  ;;  %759 = vst [vmem:[#allocation16 + $0x18] sm:$0xff] %v751_v41 }
 0x1aa   :  { %763 = vst [vmem:[#allocation16 + $0x38] sm:$0xff] %v755_v43 }
 0x1ab   :  { %1190 = shalt.err (!%p1187_p10)
}
 0x1ac   :  { %s1191_s20 = scalar_lea.hbm %s1459_s9, 1024 }
 0x1ad   :  { %p1192_p11 = scmp.ne.s32.totalorder %s1459_s9, %s1191_s20  ;;  %p1195_p12 = scmp.lt.u32.totalorder %s1191_s20, %s1459_s9 }
 0x1af   :  { %p1197_p13 = pnand %p1195_p12, %p1192_p11 }
 0x1b1   :  { %1200 = shalt.err (!%p1197_p13)
}
 0x1b2   :  { %799 = dma.vmem_to_hbm [thread:$0]  %s794_s4, 1024, %s1459_s9, [#allocation15], %s1213_s21, %s1213_s21, %s1214_s22  }
 0x1b3   :  { %1207 = dma.done.wait [#allocation7], 1024  }
 0x1b4   :  { %1208 = vsyncadd [#allocation7], 4294966272 }
 0x1b5   :  { %1209 = dma.done.wait [#allocation15], 2048  }
 0x1b6   :  { %1210 = vsyncadd [#allocation15], 4294965248 }
 0x1b7   :  { %809 = vsyncpa [#allocation6], 1 }
 0x1b8   :  { %810 = vsyncpa [#allocation9], 1 }
 0x1b9   :  { %811 = vsyncpa [#allocation12], 1 }
 0x1ba   :  { %812 = vsyncpa [#allocation7], 1 }
 0x1bb   :  { %813 = vsyncpa [#allocation15], 1 }

</bundles_post_ra>
